<compile_context>
chip_gen: v7x
topology: tpu7x:2x2x1
jax: 0.10.0
libtpu: 0.0.40
codegen_flags: <defaults>
</compile_context>

<pallas_src>
import functools

import jax
import jax.numpy as jnp
from jax.experimental import pallas as pl
from jax.experimental.pallas import tpu as pltpu

HIDDEN = 64          # hidden_fc in the PyTorch module
FUSED = 2 * HIDDEN   # 128: fused actor/value trunk width == one full lane dim
OUT_LANES = 128      # lane-dense output slab width (mu | sigma | v | pad)


def _round_up(x, m):
    return ((x + m - 1) // m) * m


# ----------------------------------------------------------------------------
# Kernel
# ----------------------------------------------------------------------------
def _fused_kernel(a_dim,
                  st_ref,
                  w0, b0, w1, b1, w2, b2,    # fused [actor_head | value] trunk
                  whb, bhx,                  # fused [mu/sigma hidden | value-skip] (128,256)
                  wfa, bf,                   # fused output layer (mu|sigma)
                  amax_ref,                  # (1,1) scalar in SMEM
                  out_ref):
    x = st_ref[...]

    def mm(a, w_ref):
        # Cast the activation to the weight dtype (bf16 path is a *real* bf16
        # matmul); accumulate in f32 on the MXU.
        return jnp.dot(a.astype(w_ref.dtype), w_ref[...],
                       preferred_element_type=jnp.float32)

    def relu(z):
        return jnp.maximum(z, 0.0)

    # Trunk: actor_head (lanes 0:64) and value MLP (lanes 64:128) in one stream.
    t = relu(mm(x, w0) + b0[...])
    t = relu(mm(t, w1) + b1[...])
    t = relu(mm(t, w2) + b2[...])     # t[:, :64] = policy_h, t[:, 64:] = value hidden

    # One N=256 matmul: lanes [0:128) = mu/sigma hidden pre-act, [128:256) = value/skip.
    th = mm(t, whb) + bhx[...]
    hh = relu(th[:, :FUSED])          # vreg-boundary slice: free
    pre = mm(hh, wfa) + th[:, FUSED:] + bf[...]
    # pre lanes: [0:a) = mu pre-act, [a:2a) = sigma pre-act, [2a] = value, rest pad.

    a_max = amax_ref[0, 0]                                      # SMEM scalar
    lane = jax.lax.broadcasted_iota(jnp.int32, (1, OUT_LANES), 1)
    is_mu = lane < a_dim
    # One sigmoid for both heads: tanh(x) = 2*sigmoid(2x) - 1.
    s = jax.nn.sigmoid(jnp.where(is_mu, 2.0 * pre, pre))
    mu = (2.0 * s - 1.0) * a_max
    sg = 10.0 * s + 0.0001
    out_ref[...] = jnp.where(is_mu, mu, jnp.where(lane < 2 * a_dim, sg, pre))


# ----------------------------------------------------------------------------
# Weight fusion (done once, outside the kernel)
# ----------------------------------------------------------------------------
def _blockdiag(a, b):
    za = jnp.zeros((a.shape[0], b.shape[1]), jnp.float32)
    zb = jnp.zeros((b.shape[0], a.shape[1]), jnp.float32)
    return jnp.concatenate(
        [jnp.concatenate([a, za], axis=1),
         jnp.concatenate([zb, b], axis=1)], axis=0)


def fuse_params(p, a_dim):
    """Concat / block-diagonalize per-branch weights into fused lane-dense weights."""
    assert 2 * a_dim + 1 <= OUT_LANES, "a_dim too large for 128-lane output slab"
    a = a_dim
    f = {}
    # Trunk layer 0: st @ [ah_w0 | v_w0]
    f["w0"] = jnp.concatenate([p["ah_w0"], p["v_w0"]], axis=1)       # (in, 128)
    f["b0"] = jnp.concatenate([p["ah_b0"], p["v_b0"]], axis=1)       # (1, 128)
    # Trunk layers 1/2: block-diagonal so actor/value lanes stay independent.
    f["w1"] = _blockdiag(p["ah_w1"], p["v_w1"])                      # (128, 128)
    f["b1"] = jnp.concatenate([p["ah_b1"], p["v_b1"]], axis=1)
    f["w2"] = _blockdiag(p["ah_w2"], p["v_w2"])
    f["b2"] = jnp.concatenate([p["ah_b2"], p["v_b2"]], axis=1)

    # mu/sigma hidden: rows 0:64 = [mu_w0 | sg_w0], rows 64:128 = 0.
    wh = jnp.concatenate(
        [jnp.concatenate([p["mu_w0"], p["sg_w0"]], axis=1),
         jnp.zeros((HIDDEN, FUSED), jnp.float32)], axis=0)           # (128, 128)
    # value/output skip path: rows 0:64 = 0, rows 64:128 put v_w3 at lane 2a.
    wfb_bot = jnp.concatenate(
        [jnp.zeros((HIDDEN, 2 * a), jnp.float32), p["v_w3"],
         jnp.zeros((HIDDEN, OUT_LANES - 2 * a - 1), jnp.float32)], axis=1)
    wfb = jnp.concatenate(
        [jnp.zeros((HIDDEN, OUT_LANES), jnp.float32), wfb_bot], axis=0)
    # Fuse both into one N=256 matmul.
    f["whb"] = jnp.concatenate([wh, wfb], axis=1)                    # (128, 256)
    bh = jnp.concatenate([p["mu_b0"], p["sg_b0"]], axis=1)           # (1, 128)
    f["bhx"] = jnp.concatenate(
        [bh, jnp.zeros((1, OUT_LANES), jnp.float32)], axis=1)        # (1, 256)

    # Fused mu|sigma output layer: pre = hh @ wfa (+ skip + bf)
    wfa_top = jnp.concatenate(
        [p["mu_w1"], jnp.zeros((HIDDEN, OUT_LANES - a), jnp.float32)], axis=1)
    wfa_bot = jnp.concatenate(
        [jnp.zeros((HIDDEN, a), jnp.float32), p["sg_w1"],
         jnp.zeros((HIDDEN, OUT_LANES - 2 * a), jnp.float32)], axis=1)
    f["wfa"] = jnp.concatenate([wfa_top, wfa_bot], axis=0)           # (128, 128)
    f["bf"] = jnp.concatenate(
        [p["mu_b1"], p["sg_b1"], p["v_b3"],
         jnp.zeros((1, OUT_LANES - 2 * a - 1), jnp.float32)], axis=1)
    return f


# ----------------------------------------------------------------------------
# Wrapper
# ----------------------------------------------------------------------------
def _pick_batch_tile(B, input_dim, compute_dtype):
    row = 16 if compute_dtype == jnp.bfloat16 else 8      # bf16 sublane tile is 16
    act_bytes = 2 if compute_dtype == jnp.bfloat16 else 4
    # Double-buffered st/out streams plus ~8 live (row,128) f32 intermediates
    # (t, th(2x), hh, pre, s, epilogue temps).
    per_row = 2 * act_bytes * input_dim + 2 * 4 * OUT_LANES + 8 * 4 * OUT_LANES
    budget = 16 << 20                                       # fits v7x's smaller VMEM too
    tb_cap = max(row, min(budget // per_row, 1024))
    tb_cap = (tb_cap // row) * row
    b_pad = _round_up(B, row)
    if b_pad <= tb_cap:
        if b_pad >= 512:
            # Large enough batch: give megacore (v7x, 2 TCs) at least 2 tiles.
            return _round_up((b_pad + 1) // 2, 128)
        return b_pad                                        # small batch: grid=1
    return max(128, (tb_cap // 128) * 128)                  # big batch: 128-aligned tiles


def actor_critic_forward(st, fused, a_dim, a_max, learn_var=True,
                         compute_dtype=None):
    """Replicates ActorCritic.forward: returns (mu, sigma, v)."""
    B, input_dim = st.shape
    if compute_dtype is None:
        # bf16 MXU path only pays off at large batch; small RL batches stay f32.
        compute_dtype = jnp.bfloat16 if B >= 1024 else jnp.float32

    TB = _pick_batch_tile(B, input_dim, compute_dtype)
    Bp = _round_up(B, TB)
    if Bp != B:
        st = jnp.pad(st, ((0, Bp - B), (0, 0)))

    weight_keys = ["w0", "b0", "w1", "b1", "w2", "b2", "whb", "bhx", "wfa", "bf"]
    ws = [fused[k] for k in weight_keys]
    if compute_dtype != jnp.float32:
        st = st.astype(compute_dtype)
        # Weights in compute dtype (halves weight DMA bytes); biases stay f32.
        ws = [w.astype(compute_dtype) if w.shape[0] != 1 else w for w in ws]

    a_max_arr = jnp.full((1, 1), a_max, dtype=jnp.float32)

    def resident(arr):  # whole array, same block every grid step -> stays in VMEM
        return pl.BlockSpec(arr.shape, lambda i: (0, 0))

    out = pl.pallas_call(
        functools.partial(_fused_kernel, a_dim),
        out_shape=jax.ShapeDtypeStruct((Bp, OUT_LANES), jnp.float32),
        grid=(Bp // TB,),
        in_specs=[pl.BlockSpec((TB, input_dim), lambda i: (i, 0))]
                 + [resident(w) for w in ws]
                 + [pl.BlockSpec(memory_space=pltpu.MemorySpace.SMEM)],
        out_specs=pl.BlockSpec((TB, OUT_LANES), lambda i: (i, 0)),
        compiler_params=pltpu.CompilerParams(
            dimension_semantics=("parallel",),
            vmem_limit_bytes=32 * 1024 * 1024),
    )(st, *ws, a_max_arr)

    mu = out[:B, :a_dim]
    v = out[:B, 2 * a_dim]          # value head has width 1, matches torch v[:, -1]
    if learn_var:
        sigma = out[:B, a_dim:2 * a_dim]
    else:
        # Fixed (non-learned) variance parameter path of the PyTorch module
        # (self.var has shape (1, a_dim) in torch, returned as-is).
        sigma = jnp.full((1, a_dim), 0.3, dtype=jnp.float32)
    return mu, sigma, v


# ----------------------------------------------------------------------------
# Parameter init (PyTorch-Linear-style uniform; weights stored [in, out])
# ----------------------------------------------------------------------------
def init_params(key, input_dim, a_dim):
    params = {}

    def linear(k, fan_in, fan_out):
        kw, kb = jax.random.split(k)
        bound = 1.0 / jnp.sqrt(fan_in)
        w = jax.random.uniform(kw, (fan_in, fan_out), jnp.float32, -bound, bound)
        b = jax.random.uniform(kb, (1, fan_out), jnp.float32, -bound, bound)
        return w, b

    keys = jax.random.split(key, 11)
    params["ah_w0"], params["ah_b0"] = linear(keys[0], input_dim, HIDDEN)
    params["ah_w1"], params["ah_b1"] = linear(keys[1], HIDDEN, HIDDEN)
    params["ah_w2"], params["ah_b2"] = linear(keys[2], HIDDEN, HIDDEN)
    params["mu_w0"], params["mu_b0"] = linear(keys[3], HIDDEN, HIDDEN)
    params["mu_w1"], params["mu_b1"] = linear(keys[4], HIDDEN, a_dim)
    params["sg_w0"], params["sg_b0"] = linear(keys[5], HIDDEN, HIDDEN)
    params["sg_w1"], params["sg_b1"] = linear(keys[6], HIDDEN, a_dim)
    params["v_w0"], params["v_b0"] = linear(keys[7], input_dim, HIDDEN)
    params["v_w1"], params["v_b1"] = linear(keys[8], HIDDEN, HIDDEN)
    params["v_w2"], params["v_b2"] = linear(keys[9], HIDDEN, HIDDEN)
    params["v_w3"], params["v_b3"] = linear(keys[10], HIDDEN, 1)
    return params


def reference_forward(st, p, a_max):
    """Pure-JAX reference (unfused weights) for correctness checking."""
    relu = lambda x: jnp.maximum(x, 0.0)
    lin = lambda x, w, b: x @ w + b
    h = relu(lin(st, p["ah_w0"], p["ah_b0"]))
    h = relu(lin(h, p["ah_w1"], p["ah_b1"]))
    h = relu(lin(h, p["ah_w2"], p["ah_b2"]))
    m = relu(lin(h, p["mu_w0"], p["mu_b0"]))
    mu = jnp.tanh(lin(m, p["mu_w1"], p["mu_b1"])) * a_max
    s = relu(lin(h, p["sg_w0"], p["sg_b0"]))
    sigma = jax.nn.sigmoid(lin(s, p["sg_w1"], p["sg_b1"])) * 10.0 + 0.0001
    v = relu(lin(st, p["v_w0"], p["v_b0"]))
    v = relu(lin(v, p["v_w1"], p["v_b1"]))
    v = relu(lin(v, p["v_w2"], p["v_b2"]))
    v = lin(v, p["v_w3"], p["v_b3"])[:, -1]
    return mu, sigma, v


# TODO(synk): get_action/evaluate (MultivariateNormal sample / log_prob / entropy)
# are distribution ops outside the forward pass and are not implemented as kernels.

if __name__ == "__main__":
    B = 8
    INPUT_DIM = 32
    A_DIM = 4
    A_MAX = 2.0

    key = jax.random.PRNGKey(0)
    k_st, k_p = jax.random.split(key)
    st = jax.random.normal(k_st, (B, INPUT_DIM), dtype=jnp.float32)
    params = init_params(k_p, INPUT_DIM, A_DIM)
    fused = fuse_params(params, A_DIM)      # concat / blockdiag once, in the wrapper

    # Default (small-batch -> f32) path, checked tightly against the reference.
    mu, sigma, v = actor_critic_forward(st, fused, A_DIM, A_MAX, learn_var=True)
    jax.block_until_ready((mu, sigma, v))

    mu_r, sigma_r, v_r = reference_forward(st, params, A_MAX)
    assert mu.shape == (B, A_DIM) and sigma.shape == (B, A_DIM) and v.shape == (B,)
    assert jnp.allclose(mu, mu_r, atol=1e-4, rtol=1e-4)
    assert jnp.allclose(sigma, sigma_r, atol=1e-4, rtol=1e-4)
    assert jnp.allclose(v, v_r, atol=1e-4, rtol=1e-4)

    # Exercise the real-bf16 MXU path (default for large batches); loose tolerance.
    mu_b, sigma_b, v_b = actor_critic_forward(st, fused, A_DIM, A_MAX,
                                              learn_var=True,
                                              compute_dtype=jnp.bfloat16)
    jax.block_until_ready((mu_b, sigma_b, v_b))
    assert mu_b.shape == (B, A_DIM) and sigma_b.shape == (B, A_DIM) and v_b.shape == (B,)
    assert jnp.allclose(mu_b, mu_r, atol=0.2, rtol=0.05)
    assert jnp.allclose(sigma_b, sigma_r, atol=0.3, rtol=0.05)
    assert jnp.allclose(v_b, v_r, atol=0.3, rtol=0.05)

    print("KERNEL_OK")
</pallas_src>

<mosaic_0001>
module attributes {stable_mosaic.version = 11 : i64} {
  func.func @_fused_kernel(%arg0: i32, %arg1: memref<8x32xf32, #tpu.memory_space<vmem>>, %arg2: memref<32x128xf32, #tpu.memory_space<vmem>>, %arg3: memref<1x128xf32, #tpu.memory_space<vmem>>, %arg4: memref<128x128xf32, #tpu.memory_space<vmem>>, %arg5: memref<1x128xf32, #tpu.memory_space<vmem>>, %arg6: memref<128x128xf32, #tpu.memory_space<vmem>>, %arg7: memref<1x128xf32, #tpu.memory_space<vmem>>, %arg8: memref<128x256xf32, #tpu.memory_space<vmem>>, %arg9: memref<1x256xf32, #tpu.memory_space<vmem>>, %arg10: memref<128x128xf32, #tpu.memory_space<vmem>>, %arg11: memref<1x128xf32, #tpu.memory_space<vmem>>, %arg12: memref<1x1xf32, #tpu.memory_space<smem>>, %arg13: memref<8x128xf32, #tpu.memory_space<vmem>>) attributes {dimension_semantics = [#tpu.dimension_semantics<parallel>], iteration_bounds = array<i64: 1>, scalar_prefetch = 0 : i64, scratch_operands = 0 : i64, tpu.core_type = #tpu.core_type<tc>, window_params = [{transform_indices = @transform_0, window_bounds = array<i64: 8, 32>}, {pipeline_mode = #tpu.pipeline_mode<synchronous>, transform_indices = @transform_1, window_bounds = array<i64: 32, 128>}, {pipeline_mode = #tpu.pipeline_mode<synchronous>, transform_indices = @transform_2, window_bounds = array<i64: 1, 128>}, {pipeline_mode = #tpu.pipeline_mode<synchronous>, transform_indices = @transform_3, window_bounds = array<i64: 128, 128>}, {pipeline_mode = #tpu.pipeline_mode<synchronous>, transform_indices = @transform_4, window_bounds = array<i64: 1, 128>}, {pipeline_mode = #tpu.pipeline_mode<synchronous>, transform_indices = @transform_5, window_bounds = array<i64: 128, 128>}, {pipeline_mode = #tpu.pipeline_mode<synchronous>, transform_indices = @transform_6, window_bounds = array<i64: 1, 128>}, {pipeline_mode = #tpu.pipeline_mode<synchronous>, transform_indices = @transform_7, window_bounds = array<i64: 128, 256>}, {pipeline_mode = #tpu.pipeline_mode<synchronous>, transform_indices = @transform_8, window_bounds = array<i64: 1, 256>}, {pipeline_mode = #tpu.pipeline_mode<synchronous>, transform_indices = @transform_9, window_bounds = array<i64: 128, 128>}, {pipeline_mode = #tpu.pipeline_mode<synchronous>, transform_indices = @transform_10, window_bounds = array<i64: 1, 128>}, {transform_indices = @transform_11, window_bounds = array<i64: 1, 1>}, {transform_indices = @transform_12, window_bounds = array<i64: 8, 128>}]} {
    %c0 = arith.constant 0 : index
    %c0_0 = arith.constant 0 : index
    %0 = vector.load %arg1[%c0, %c0_0] : memref<8x32xf32, #tpu.memory_space<vmem>>, vector<8x32xf32>
    %c0_1 = arith.constant 0 : index
    %c0_2 = arith.constant 0 : index
    %1 = vector.load %arg2[%c0_1, %c0_2] : memref<32x128xf32, #tpu.memory_space<vmem>>, vector<32x128xf32>
    %cst = arith.constant dense<0.000000e+00> : vector<8x128xf32>
    %2 = tpu.matmul %0, %1, %cst {dimension_numbers = #tpu.dot_dimension_numbers<[1], [0], [0], [1], [0, 0, 1, 1], [], []>} : vector<8x32xf32>, vector<32x128xf32>, vector<8x128xf32> -> vector<8x128xf32>
    %c0_3 = arith.constant 0 : index
    %c0_4 = arith.constant 0 : index
    %3 = vector.load %arg3[%c0_3, %c0_4] : memref<1x128xf32, #tpu.memory_space<vmem>>, vector<1x128xf32>
    %4 = vector.broadcast %3 : vector<1x128xf32> to vector<8x128xf32>
    %5 = arith.addf %2, %4 : vector<8x128xf32>
    %cst_5 = arith.constant 0.000000e+00 : f32
    %6 = vector.broadcast %cst_5 : f32 to vector<8x128xf32>
    %7 = arith.maximumf %5, %6 : vector<8x128xf32>
    %c0_6 = arith.constant 0 : index
    %c0_7 = arith.constant 0 : index
    %8 = vector.load %arg4[%c0_6, %c0_7] : memref<128x128xf32, #tpu.memory_space<vmem>>, vector<128x128xf32>
    %cst_8 = arith.constant dense<0.000000e+00> : vector<8x128xf32>
    %9 = tpu.matmul %7, %8, %cst_8 {dimension_numbers = #tpu.dot_dimension_numbers<[1], [0], [0], [1], [0, 0, 1, 1], [], []>} : vector<8x128xf32>, vector<128x128xf32>, vector<8x128xf32> -> vector<8x128xf32>
    %c0_9 = arith.constant 0 : index
    %c0_10 = arith.constant 0 : index
    %10 = vector.load %arg5[%c0_9, %c0_10] : memref<1x128xf32, #tpu.memory_space<vmem>>, vector<1x128xf32>
    %11 = vector.broadcast %10 : vector<1x128xf32> to vector<8x128xf32>
    %12 = arith.addf %9, %11 : vector<8x128xf32>
    %cst_11 = arith.constant 0.000000e+00 : f32
    %13 = vector.broadcast %cst_11 : f32 to vector<8x128xf32>
    %14 = arith.maximumf %12, %13 : vector<8x128xf32>
    %c0_12 = arith.constant 0 : index
    %c0_13 = arith.constant 0 : index
    %15 = vector.load %arg6[%c0_12, %c0_13] : memref<128x128xf32, #tpu.memory_space<vmem>>, vector<128x128xf32>
    %cst_14 = arith.constant dense<0.000000e+00> : vector<8x128xf32>
    %16 = tpu.matmul %14, %15, %cst_14 {dimension_numbers = #tpu.dot_dimension_numbers<[1], [0], [0], [1], [0, 0, 1, 1], [], []>} : vector<8x128xf32>, vector<128x128xf32>, vector<8x128xf32> -> vector<8x128xf32>
    %c0_15 = arith.constant 0 : index
    %c0_16 = arith.constant 0 : index
    %17 = vector.load %arg7[%c0_15, %c0_16] : memref<1x128xf32, #tpu.memory_space<vmem>>, vector<1x128xf32>
    %18 = vector.broadcast %17 : vector<1x128xf32> to vector<8x128xf32>
    %19 = arith.addf %16, %18 : vector<8x128xf32>
    %cst_17 = arith.constant 0.000000e+00 : f32
    %20 = vector.broadcast %cst_17 : f32 to vector<8x128xf32>
    %21 = arith.maximumf %19, %20 : vector<8x128xf32>
    %c0_18 = arith.constant 0 : index
    %c0_19 = arith.constant 0 : index
    %22 = vector.load %arg8[%c0_18, %c0_19] : memref<128x256xf32, #tpu.memory_space<vmem>>, vector<128x256xf32>
    %cst_20 = arith.constant dense<0.000000e+00> : vector<8x256xf32>
    %23 = tpu.matmul %21, %22, %cst_20 {dimension_numbers = #tpu.dot_dimension_numbers<[1], [0], [0], [1], [0, 0, 1, 1], [], []>} : vector<8x128xf32>, vector<128x256xf32>, vector<8x256xf32> -> vector<8x256xf32>
    %c0_21 = arith.constant 0 : index
    %c0_22 = arith.constant 0 : index
    %24 = vector.load %arg9[%c0_21, %c0_22] : memref<1x256xf32, #tpu.memory_space<vmem>>, vector<1x256xf32>
    %25 = vector.broadcast %24 : vector<1x256xf32> to vector<8x256xf32>
    %26 = arith.addf %23, %25 : vector<8x256xf32>
    %27 = vector.extract_strided_slice %26 {offsets = [0, 0], sizes = [8, 128], strides = [1, 1]} : vector<8x256xf32> to vector<8x128xf32>
    %cst_23 = arith.constant 0.000000e+00 : f32
    %28 = vector.broadcast %cst_23 : f32 to vector<8x128xf32>
    %29 = arith.maximumf %27, %28 : vector<8x128xf32>
    %c0_24 = arith.constant 0 : index
    %c0_25 = arith.constant 0 : index
    %30 = vector.load %arg10[%c0_24, %c0_25] : memref<128x128xf32, #tpu.memory_space<vmem>>, vector<128x128xf32>
    %cst_26 = arith.constant dense<0.000000e+00> : vector<8x128xf32>
    %31 = tpu.matmul %29, %30, %cst_26 {dimension_numbers = #tpu.dot_dimension_numbers<[1], [0], [0], [1], [0, 0, 1, 1], [], []>} : vector<8x128xf32>, vector<128x128xf32>, vector<8x128xf32> -> vector<8x128xf32>
    %32 = vector.extract_strided_slice %26 {offsets = [0, 128], sizes = [8, 128], strides = [1, 1]} : vector<8x256xf32> to vector<8x128xf32>
    %33 = arith.addf %31, %32 : vector<8x128xf32>
    %c0_27 = arith.constant 0 : index
    %c0_28 = arith.constant 0 : index
    %34 = vector.load %arg11[%c0_27, %c0_28] : memref<1x128xf32, #tpu.memory_space<vmem>>, vector<1x128xf32>
    %35 = vector.broadcast %34 : vector<1x128xf32> to vector<8x128xf32>
    %36 = arith.addf %33, %35 : vector<8x128xf32>
    %c0_29 = arith.constant 0 : index
    %c0_30 = arith.constant 0 : index
    %37 = memref.load %arg12[%c0_29, %c0_30] : memref<1x1xf32, #tpu.memory_space<smem>>
    %38 = tpu.iota {dimensions = array<i32: 1>} : vector<1x128xi32>
    %c4_i32 = arith.constant 4 : i32
    %39 = vector.broadcast %c4_i32 : i32 to vector<1x128xi32>
    %40 = arith.cmpi slt, %38, %39 : vector<1x128xi32>
    %cst_31 = arith.constant 2.000000e+00 : f32
    %41 = vector.broadcast %cst_31 : f32 to vector<8x128xf32>
    %42 = arith.mulf %41, %36 : vector<8x128xf32>
    %43 = vector.shape_cast %40 : vector<1x128xi1> to vector<1x128xi1>
    %44 = vector.broadcast %43 : vector<1x128xi1> to vector<8x128xi1>
    %45 = arith.select %44, %42, %36 : vector<8x128xi1>, vector<8x128xf32>
    %46 = arith.negf %45 : vector<8x128xf32>
    %47 = math.exp %46 : vector<8x128xf32>
    %cst_32 = arith.constant 1.000000e+00 : f32
    %48 = vector.broadcast %cst_32 : f32 to vector<8x128xf32>
    %49 = arith.addf %48, %47 : vector<8x128xf32>
    %50 = arith.divf %48, %49 : vector<8x128xf32>
    %cst_33 = arith.constant 2.000000e+00 : f32
    %51 = vector.broadcast %cst_33 : f32 to vector<8x128xf32>
    %52 = arith.mulf %51, %50 : vector<8x128xf32>
    %cst_34 = arith.constant 1.000000e+00 : f32
    %53 = vector.broadcast %cst_34 : f32 to vector<8x128xf32>
    %54 = arith.subf %52, %53 : vector<8x128xf32>
    %55 = vector.broadcast %37 : f32 to vector<8x128xf32>
    %56 = arith.mulf %54, %55 : vector<8x128xf32>
    %cst_35 = arith.constant 1.000000e+01 : f32
    %57 = vector.broadcast %cst_35 : f32 to vector<8x128xf32>
    %58 = arith.mulf %57, %50 : vector<8x128xf32>
    %cst_36 = arith.constant 9.99999974E-5 : f32
    %59 = vector.broadcast %cst_36 : f32 to vector<8x128xf32>
    %60 = arith.addf %58, %59 : vector<8x128xf32>
    %c8_i32 = arith.constant 8 : i32
    %61 = vector.broadcast %c8_i32 : i32 to vector<1x128xi32>
    %62 = arith.cmpi slt, %38, %61 : vector<1x128xi32>
    %63 = vector.shape_cast %62 : vector<1x128xi1> to vector<1x128xi1>
    %64 = vector.broadcast %63 : vector<1x128xi1> to vector<8x128xi1>
    %65 = arith.select %64, %60, %36 : vector<8x128xi1>, vector<8x128xf32>
    %66 = vector.shape_cast %40 : vector<1x128xi1> to vector<1x128xi1>
    %67 = vector.broadcast %66 : vector<1x128xi1> to vector<8x128xi1>
    %68 = arith.select %67, %56, %65 : vector<8x128xi1>, vector<8x128xf32>
    %c0_37 = arith.constant 0 : index
    %c0_38 = arith.constant 0 : index
    %69 = vector.load %arg13[%c0_37, %c0_38] : memref<8x128xf32, #tpu.memory_space<vmem>>, vector<8x128xf32>
    tpu.vector_store %arg13[%c0_37, %c0_38], %68 {strides = array<i32>} : memref<8x128xf32, #tpu.memory_space<vmem>>, vector<8x128xf32>,
    return
  }
  func.func @transform_0(%arg0: i32) -> (i32, i32) {
    %c0_i32 = arith.constant 0 : i32
    %c0_i32_0 = arith.constant 0 : i32
    return %arg0, %c0_i32 : i32, i32
  }
  func.func @transform_1(%arg0: i32) -> (i32, i32) {
    %c0_i32 = arith.constant 0 : i32
    %c0_i32_0 = arith.constant 0 : i32
    %c0_i32_1 = arith.constant 0 : i32
    return %c0_i32, %c0_i32_0 : i32, i32
  }
  func.func @transform_2(%arg0: i32) -> (i32, i32) {
    %c0_i32 = arith.constant 0 : i32
    %c0_i32_0 = arith.constant 0 : i32
    %c0_i32_1 = arith.constant 0 : i32
    return %c0_i32, %c0_i32_0 : i32, i32
  }
  func.func @transform_3(%arg0: i32) -> (i32, i32) {
    %c0_i32 = arith.constant 0 : i32
    %c0_i32_0 = arith.constant 0 : i32
    %c0_i32_1 = arith.constant 0 : i32
    return %c0_i32, %c0_i32_0 : i32, i32
  }
  func.func @transform_4(%arg0: i32) -> (i32, i32) {
    %c0_i32 = arith.constant 0 : i32
    %c0_i32_0 = arith.constant 0 : i32
    %c0_i32_1 = arith.constant 0 : i32
    return %c0_i32, %c0_i32_0 : i32, i32
  }
  func.func @transform_5(%arg0: i32) -> (i32, i32) {
    %c0_i32 = arith.constant 0 : i32
    %c0_i32_0 = arith.constant 0 : i32
    %c0_i32_1 = arith.constant 0 : i32
    return %c0_i32, %c0_i32_0 : i32, i32
  }
  func.func @transform_6(%arg0: i32) -> (i32, i32) {
    %c0_i32 = arith.constant 0 : i32
    %c0_i32_0 = arith.constant 0 : i32
    %c0_i32_1 = arith.constant 0 : i32
    return %c0_i32, %c0_i32_0 : i32, i32
  }
  func.func @transform_7(%arg0: i32) -> (i32, i32) {
    %c0_i32 = arith.constant 0 : i32
    %c0_i32_0 = arith.constant 0 : i32
    %c0_i32_1 = arith.constant 0 : i32
    return %c0_i32, %c0_i32_0 : i32, i32
  }
  func.func @transform_8(%arg0: i32) -> (i32, i32) {
    %c0_i32 = arith.constant 0 : i32
    %c0_i32_0 = arith.constant 0 : i32
    %c0_i32_1 = arith.constant 0 : i32
    return %c0_i32, %c0_i32_0 : i32, i32
  }
  func.func @transform_9(%arg0: i32) -> (i32, i32) {
    %c0_i32 = arith.constant 0 : i32
    %c0_i32_0 = arith.constant 0 : i32
    %c0_i32_1 = arith.constant 0 : i32
    return %c0_i32, %c0_i32_0 : i32, i32
  }
  func.func @transform_10(%arg0: i32) -> (i32, i32) {
    %c0_i32 = arith.constant 0 : i32
    %c0_i32_0 = arith.constant 0 : i32
    %c0_i32_1 = arith.constant 0 : i32
    return %c0_i32, %c0_i32_0 : i32, i32
  }
  func.func @transform_11(%arg0: i32) -> (i32, i32) {
    %c0_i32 = arith.constant 0 : i32
    %c0_i32_0 = arith.constant 0 : i32
    %c0_i32_1 = arith.constant 0 : i32
    return %c0_i32, %c0_i32_0 : i32, i32
  }
  func.func @transform_12(%arg0: i32) -> (i32, i32) {
    %c0_i32 = arith.constant 0 : i32
    %c0_i32_0 = arith.constant 0 : i32
    return %arg0, %c0_i32 : i32, i32
  }
}

</mosaic_0001>

<bundles_post_ra>
// kernel: tpu_custom_call.1
= control target key start
LH: loop header
LB: loop body
LE: loop exit
PB: predicated region body
PF: predicated region fallthrough
CT: control target
= control target key end

     0   :  { %18 = vsyncpa [#allocation4], 0  ;;  %s1353_s0 = inlined_call_operand.hbm [shape: f32[8,32], index: 0, kind: input, shape index: {}]   ;;  %s1354_s1 = inlined_call_operand.hbm [shape: f32[32,128], index: 1, kind: input, shape index: {}]   ;;  %s1355_s2 = inlined_call_operand.vmem [shape: f32[1,128], index: 2, kind: input, shape index: {}]   ;;  %s1356_s3 = inlined_call_operand.hbm [shape: f32[128,128], index: 3, kind: input, shape index: {}]   ;;  %s1357_s4 = inlined_call_operand.vmem [shape: f32[1,128], index: 4, kind: input, shape index: {}]   ;;  %s1358_s5 = inlined_call_operand.hbm [shape: f32[128,128], index: 5, kind: input, shape index: {}]   ;;  %s1359_s6 = inlined_call_operand.vmem [shape: f32[1,128], index: 6, kind: input, shape index: {}]   ;;  %s1360_s7 = inlined_call_operand.hbm [shape: f32[128,256], index: 7, kind: input, shape index: {}]   ;;  %s1361_s8 = inlined_call_operand.vmem [shape: f32[1,256], index: 8, kind: input, shape index: {}]   ;;  %s1362_s9 = inlined_call_operand.hbm [shape: f32[128,128], index: 9, kind: input, shape index: {}]   ;;  %s1363_s10 = inlined_call_operand.vmem [shape: f32[1,128], index: 10, kind: input, shape index: {}]   ;;  %s1364_s11 = inlined_call_operand.<no memory space> [shape: f32[1,1], index: 11, kind: input, shape index: {}]   ;;  %s1365_s12 = inlined_call_operand.hbm [shape: f32[8,128], index: 12, kind: output, shape index: {}]  }
   0x1   :  { %19 = vsyncpa [#allocation7], 0 }
   0x2   :  { %20 = vsyncpa [#allocation10], 0 }
   0x3   :  { %21 = vsyncpa [#allocation13], 0 }
   0x4   :  { %22 = vsyncpa [#allocation5], 0  ;;  %s1123_s21 = smov [#allocation6]   ;;  %s959_s25 = scalar_lea.hbm %s1354_s1, 512 }
   0x5   :  { %s38_s22 = sshll.u32 %s1123_s21, 4  ;;  %p960_p0 = scmp.ne.s32.totalorder %s1354_s1, %s959_s25  ;;  %s39_s22 = int_to_ptr.vmem [resolvable:$true] %s38_s22 }
   0x6   :  { %p963_p1 = scmp.lt.u32.totalorder %s959_s25, %s1354_s1 }
   0x8   :  { %p965_p2 = pnand %p963_p1, %p960_p0 }
   0xa   :  { %968 = shalt.err (!%p965_p2)
}
   0xb   :  { %s969_s30 = scalar_lea.vmem %s39_s22, 512  ;;  %p974_p4 = scmp.lt.s32.totalorder %s39_s22, %s39_s22 }
   0xc   :  { %p970_p3 = scmp.ne.s32.totalorder %s39_s22, %s969_s30  ;;  %p975_p5 = scmp.lt.s32.totalorder %s969_s30, %s969_s30 }
   0xe   :  { %p976_p6 = por %p975_p5, %p974_p4 }
  0x10   :  { %p977_p7 = pnand %p976_p6, %p970_p3 }
  0x12   :  { %980 = shalt.err (!%p977_p7)
}
  0x13   :  { %s1124_s13 = smov 128   ;;  %s1125_s14 = smov 8  }
  0x14   :  { %44 = dma.hbm_to_vmem [thread:$0]  %s1354_s1, 512, %s39_s22, [#allocation7], %s1124_s13, %s1124_s13, %s1125_s14  }
  0x15   :  { %s1126_s17 = smov [#allocation9]   ;;  %s1127_s19 = smov [#allocation3]  }
  0x16   :  { %s66_s18 = sshll.u32 %s1126_s17, 4  ;;  %s29_s20 = sshll.u32 %s1127_s19, 4  ;;  %s67_s18 = int_to_ptr.vmem [resolvable:$true] %s66_s18  ;;  %s30_s20 = int_to_ptr.vmem [resolvable:$true] %s29_s20 }
  0x17   :  { %s981_s24 = scalar_lea.hbm %s1358_s5, 2048 }
  0x18   :  { %p982_p8 = scmp.ne.s32.totalorder %s1358_s5, %s981_s24  ;;  %p985_p9 = scmp.lt.u32.totalorder %s981_s24, %s1358_s5 }
  0x1a   :  { %p987_p10 = pnand %p985_p9, %p982_p8 }
  0x1c   :  { %990 = shalt.err (!%p987_p10)
}
  0x1d   :  { %s991_s1 = scalar_lea.vmem %s67_s18, 2048  ;;  %p996_p12 = scmp.lt.s32.totalorder %s67_s18, %s67_s18 }
  0x1e   :  { %p992_p11 = scmp.ne.s32.totalorder %s67_s18, %s991_s1  ;;  %p997_p13 = scmp.lt.s32.totalorder %s991_s1, %s991_s1 }
  0x20   :  { %p998_p0 = por %p997_p13, %p996_p12 }
  0x22   :  { %p999_p1 = pnand %p998_p0, %p992_p11 }
  0x24   :  { %1002 = shalt.err (!%p999_p1)
}
  0x25   :  { %72 = dma.hbm_to_vmem [thread:$0]  %s1358_s5, 2048, %s67_s18, [#allocation10], %s1124_s13, %s1124_s13, %s1125_s14  }
  0x26   :  { %s1003_s16 = scalar_lea.hbm %s1353_s0, 128 }
  0x27   :  { %p1004_p2 = scmp.ne.s32.totalorder %s1353_s0, %s1003_s16  ;;  %p1007_p3 = scmp.lt.u32.totalorder %s1003_s16, %s1353_s0 }
  0x29   :  { %p1009_p4 = pnand %p1007_p3, %p1004_p2 }
  0x2b   :  { %1012 = shalt.err (!%p1009_p4)
}
  0x2c   :  { %s1013_s24 = scalar_lea.vmem %s30_s20, 128  ;;  %p1018_p6 = scmp.lt.s32.totalorder %s30_s20, %s30_s20 }
  0x2d   :  { %p1014_p5 = scmp.ne.s32.totalorder %s30_s20, %s1013_s24  ;;  %p1019_p7 = scmp.lt.s32.totalorder %s1013_s24, %s1013_s24 }
  0x2f   :  { %p1020_p8 = por %p1019_p7, %p1018_p6 }
  0x31   :  { %p1021_p9 = pnand %p1020_p8, %p1014_p5 }
  0x33   :  { %1024 = shalt.err (!%p1021_p9)
}
  0x34   :  { %32 = dma.hbm_to_vmem [thread:$0]  %s1353_s0, 128, %s30_s20, [#allocation4]  }
  0x35   :  { %s1128_s25 = smov [#allocation8]   ;;  %s1129_s27 = smov [#allocation11]  }
  0x36   :  { %s52_s26 = sshll.u32 %s1128_s25, 4  ;;  %s80_s28 = sshll.u32 %s1129_s27, 4  ;;  %s53_s26 = int_to_ptr.vmem [resolvable:$true] %s52_s26  ;;  %s81_s28 = int_to_ptr.vmem [resolvable:$true] %s80_s28 }
  0x37   :  { %s1025_s29 = scalar_lea.hbm %s1356_s3, 2048 }
  0x38   :  { %p1026_p10 = scmp.ne.s32.totalorder %s1356_s3, %s1025_s29  ;;  %p1029_p11 = scmp.lt.u32.totalorder %s1025_s29, %s1356_s3 }
  0x3a   :  { %p1031_p12 = pnand %p1029_p11, %p1026_p10 }
  0x3c   :  { %1034 = shalt.err (!%p1031_p12)
}
  0x3d   :  { %s1035_s0 = scalar_lea.vmem %s53_s26, 2048  ;;  %p1040_p0 = scmp.lt.s32.totalorder %s53_s26, %s53_s26 }
  0x3e   :  { %p1036_p13 = scmp.ne.s32.totalorder %s53_s26, %s1035_s0  ;;  %p1041_p1 = scmp.lt.s32.totalorder %s1035_s0, %s1035_s0 }
  0x40   :  { %p1042_p2 = por %p1041_p1, %p1040_p0 }
  0x42   :  { %p1043_p3 = pnand %p1042_p2, %p1036_p13 }
  0x44   :  { %1046 = shalt.err (!%p1043_p3)
}
  0x45   :  { %58 = dma.hbm_to_vmem [thread:$0]  %s1356_s3, 2048, %s53_s26, [#allocation7], %s1124_s13, %s1124_s13, %s1125_s14  }
  0x46   :  { %s1047_s24 = scalar_lea.hbm %s1360_s7, 4096 }
  0x47   :  { %p1048_p4 = scmp.ne.s32.totalorder %s1360_s7, %s1047_s24  ;;  %p1051_p5 = scmp.lt.u32.totalorder %s1047_s24, %s1360_s7 }
  0x49   :  { %p1053_p6 = pnand %p1051_p5, %p1048_p4 }
  0x4b   :  { %1056 = shalt.err (!%p1053_p6)
}
  0x4c   :  { %s1057_s1 = scalar_lea.vmem %s81_s28, 4096  ;;  %p1062_p8 = scmp.lt.s32.totalorder %s81_s28, %s81_s28 }
  0x4d   :  { %p1058_p7 = scmp.ne.s32.totalorder %s81_s28, %s1057_s1  ;;  %p1063_p9 = scmp.lt.s32.totalorder %s1057_s1, %s1057_s1 }
  0x4f   :  { %p1064_p10 = por %p1063_p9, %p1062_p8 }
  0x51   :  { %p1065_p11 = pnand %p1064_p10, %p1058_p7 }
  0x53   :  { %1068 = shalt.err (!%p1065_p11)
}
  0x54   :  { %s1130_s3 = smov 256   ;;  %s1131_s26 = smov 16  }
  0x55   :  { %86 = dma.hbm_to_vmem [thread:$0]  %s1360_s7, 4096, %s81_s28, [#allocation10], %s1130_s3, %s1130_s3, %s1131_s26  }
  0x56   :  { %s1132_s30 = smov [#allocation12]   ;;  %s1069_s0 = scalar_lea.hbm %s1362_s9, 2048 }
  0x57   :  { %s94_s15 = sshll.u32 %s1132_s30, 4  ;;  %p1070_p12 = scmp.ne.s32.totalorder %s1362_s9, %s1069_s0  ;;  %s95_s15 = int_to_ptr.vmem [resolvable:$true] %s94_s15 }
  0x58   :  { %p1073_p13 = scmp.lt.u32.totalorder %s1069_s0, %s1362_s9 }
  0x5a   :  { %p1075_p0 = pnand %p1073_p13, %p1070_p12 }
  0x5c   :  { %1078 = shalt.err (!%p1075_p0)
}
  0x5d   :  { %s1079_s24 = scalar_lea.vmem %s95_s15, 2048  ;;  %p1084_p2 = scmp.lt.s32.totalorder %s95_s15, %s95_s15 }
  0x5e   :  { %p1080_p1 = scmp.ne.s32.totalorder %s95_s15, %s1079_s24  ;;  %p1085_p3 = scmp.lt.s32.totalorder %s1079_s24, %s1079_s24 }
  0x60   :  { %p1086_p4 = por %p1085_p3, %p1084_p2 }
  0x62   :  { %p1087_p5 = pnand %p1086_p4, %p1080_p1 }
  0x64   :  { %1090 = shalt.err (!%p1087_p5)
}
  0x65   :  { %100 = dma.hbm_to_vmem [thread:$0]  %s1362_s9, 2048, %s95_s15, [#allocation13], %s1124_s13, %s1124_s13, %s1125_s14  }
  0x66   :  { %1113 = dma.done.wait [#allocation4], 128  }
  0x67   :  { %1114 = vsyncadd [#allocation4], 4294967168 }
  0x68   :  { %1115 = dma.done.wait [#allocation7], 2560  }
  0x69   :  { %1116 = vsyncadd [#allocation7], 4294964736 }
  0x6a   :  { %1117 = dma.done.wait [#allocation10], 6144  }
  0x6b   :  { %1118 = vsyncadd [#allocation10], 4294961152 }
  0x6c   :  { %1119 = dma.done.wait [#allocation13], 2048  }
  0x6d   :  { %1120 = vsyncadd [#allocation13], 4294965248  ;;  %v1133_v0 = vmov 0.0|0.0   ;;  %vm1134_vm0 = vmmov 0   ;;  %v1135_v1 = vmov 0.0   ;;  %v124_v2 = vld [vmem:[#allocation6] sm:$0xff] }
  0x6e   :  { %831 = vmatprep.subr.bf16.mxu0 %v1133_v0  ;;  %723 = vmatprep.mubr.msk.f32.mxu0 %vm1134_vm0, %v1135_v1  ;;  %v125_v3 = vld [vmem:[#allocation6 + $0x8] sm:$0xff]  ;;  %v126_v4 = vld [vmem:[#allocation6 + $0x10] sm:$0xff]  ;;  %v127_v6 = vld [vmem:[#allocation6 + $0x18] sm:$0xff]  ;;  %vm135_vm1 = vcmask 261120  }
  0x6f   :  { %837 = vmatprep.subr.bf16.mxu1 %v1133_v0  ;;  %758 = vmatprep.mubr.msk.f32.mxu1 %vm1134_vm0, %v1135_v1  ;;  %v832_v5 = vpack.c.bf16 %v125_v3, %v124_v2  ;;  %v210_v7 = vld [vmem:[#allocation8] sm:$0xff]  ;;  %v211_v8 = vld [vmem:[#allocation8 + $0x8] sm:$0xff]  ;;  %v212_v9 = vld [vmem:[#allocation8 + $0x10] sm:$0xff]  ;;  %v835_v11 = vpack.c.bf16 %v127_v6, %v126_v4 }
  0x70   :  { %v213_v10 = vld [vmem:[#allocation8 + $0x18] sm:$0xff]  ;;  %v838_v12 = vpack.c.bf16 %v211_v8, %v210_v7  ;;  %v214_v14 = vld [vmem:[#allocation8 + $0x20] sm:$0xff]  ;;  %v215_v15 = vld [vmem:[#allocation8 + $0x28] sm:$0xff] }
  0x71   :  { %833 = vmatpush3.bf16.msra.mxu0 %v832_v5  ;;  %v841_v13 = vpack.c.bf16 %v213_v10, %v212_v9  ;;  %v123_v16 = vld [vmem:[#allocation3] sm:$0xff]  ;;  %v844_v17 = vpack.c.bf16 %v215_v15, %v214_v14  ;;  %v216_v18 = vld [vmem:[#allocation8 + $0x30] sm:$0xff]  ;;  %v218_v21 = vld [vmem:[#allocation8 + $0x40] sm:$0xff] }
  0x72   :  { %834 = vmatprep.subr.bf16.mxu0 %v1133_v0  ;;  %839 = vmatpush3.bf16.msra.mxu1 %v838_v12  ;;  %v217_v19 = vld [vmem:[#allocation8 + $0x38] sm:$0xff]  ;;  %v219_v22 = vld [vmem:[#allocation8 + $0x48] sm:$0xff]  ;;  %v220_v24 = vld [vmem:[#allocation8 + $0x50] sm:$0xff] }
  0x73   :  { %840 = vmatprep.subr.bf16.mxu1 %v1133_v0  ;;  %v847_v20 = vpack.c.bf16 %v217_v19, %v216_v18  ;;  %v850_v23 = vpack.c.bf16 %v219_v22, %v218_v21  ;;  %v221_v25 = vld [vmem:[#allocation8 + $0x58] sm:$0xff]  ;;  %v222_v27 = vld [vmem:[#allocation8 + $0x60] sm:$0xff]  ;;  %v223_v28 = vld [vmem:[#allocation8 + $0x68] sm:$0xff] }
  0x74   :  { %v853_v26 = vpack.c.bf16 %v221_v25, %v220_v24  ;;  %v856_v29 = vpack.c.bf16 %v223_v28, %v222_v27  ;;  %v224_v30 = vld [vmem:[#allocation8 + $0x70] sm:$0xff]  ;;  %v225_v31 = vld [vmem:[#allocation8 + $0x78] sm:$0xff]  ;;  %v304_v33 = vld [vmem:[#allocation9] sm:$0xff] }
  0x75   :  { %836 = vmatpush3.bf16.msra.mxu0 %v835_v11  ;;  %v859_v32 = vpack.c.bf16 %v225_v31, %v224_v30  ;;  %v305_v34 = vld [vmem:[#allocation9 + $0x8] sm:$0xff]  ;;  %v306_v35 = vld [vmem:[#allocation9 + $0x10] sm:$0xff]  ;;  %v307_v37 = vld [vmem:[#allocation9 + $0x18] sm:$0xff] }
  0x76   :  { %861 = vmatprep.subr.bf16.mxu0 %v1133_v0  ;;  %842 = vmatpush3.bf16.msra.mxu1 %v841_v13  ;;  %v862_v36 = vpack.c.bf16 %v305_v34, %v304_v33  ;;  %v865_v38 = vpack.c.bf16 %v307_v37, %v306_v35  ;;  %v308_v39 = vld [vmem:[#allocation9 + $0x20] sm:$0xff]  ;;  %v309_v40 = vld [vmem:[#allocation9 + $0x28] sm:$0xff]  ;;  %v310_v42 = vld [vmem:[#allocation9 + $0x30] sm:$0xff] }
  0x77   :  { %843 = vmatprep.subr.bf16.mxu1 %v1133_v0  ;;  %v868_v41 = vpack.c.bf16 %v309_v40, %v308_v39  ;;  %v311_v43 = vld [vmem:[#allocation9 + $0x38] sm:$0xff]  ;;  %v312_v45 = vld [vmem:[#allocation9 + $0x40] sm:$0xff]  ;;  %v313_v46 = vld [vmem:[#allocation9 + $0x48] sm:$0xff] }
  0x78   :  { %724 = vmatmul.mubr.msk.f32.vlgmr.msra.gmra.mrb[0].mxu0 %vm135_vm1, %v123_v16  ;;  %v871_v44 = vpack.c.bf16 %v311_v43, %v310_v42  ;;  %v874_v47 = vpack.c.bf16 %v313_v46, %v312_v45  ;;  %v314_v48 = vld [vmem:[#allocation9 + $0x50] sm:$0xff]  ;;  %v315_v49 = vld [vmem:[#allocation9 + $0x58] sm:$0xff]  ;;  %v316_v51 = vld [vmem:[#allocation9 + $0x60] sm:$0xff] }
  0x79   :  { %793 = vmatprep.mubr.msk.f32.mxu0 %vm1134_vm0, %v1135_v1  ;;  %863 = vmatpush3.bf16.msra.mxu0 %v862_v36  ;;  %v877_v50 = vpack.c.bf16 %v315_v49, %v314_v48  ;;  %v317_v52 = vld [vmem:[#allocation9 + $0x68] sm:$0xff]  ;;  %v652_v54 = vld [vmem:[%s1355_s2] ss:$0 sm:$0xff]  ;;  %v318_v59 = vld [vmem:[#allocation9 + $0x70] sm:$0xff] }
  0x7a   :  { %845 = vmatpush3.bf16.msra.mxu1 %v844_v17  ;;  %864 = vmatprep.subr.bf16.mxu0 %v1133_v0  ;;  %v880_v53 = vpack.c.bf16 %v317_v52, %v316_v51  ;;  %v319_v60 = vld [vmem:[#allocation9 + $0x78] sm:$0xff]  ;;  %v399_v62 = vld [vmem:[#allocation11 + $0x8] sm:$0xff]  ;;  %v398_v2 = vld [vmem:[#allocation11] sm:$0xff] }
  0x7b   :  { %846 = vmatprep.subr.bf16.mxu1 %v1133_v0  ;;  %v883_v61 = vpack.c.bf16 %v319_v60, %v318_v59  ;;  %v401_v63 = vld [vmem:[#allocation11 + $0x18] sm:$0xff]  ;;  %v400_v4 = vld [vmem:[#allocation11 + $0x10] sm:$0xff]  ;;  %v403_v5 = vld [vmem:[#allocation11 + $0x28] sm:$0xff] }
  0x7c   :  { %v885_v3 = vpack.c.bf16 %v401_v63, %v399_v62  ;;  %v405_v6 = vld [vmem:[#allocation11 + $0x38] sm:$0xff]  ;;  %v887_v7 = vpack.c.bf16 %v400_v4, %v398_v2  ;;  %v402_v9 = vld [vmem:[#allocation11 + $0x20] sm:$0xff]  ;;  %v404_v10 = vld [vmem:[#allocation11 + $0x30] sm:$0xff] }
  0x7d   :  { %866 = vmatpush3.bf16.msra.mxu0 %v865_v38  ;;  %v889_v8 = vpack.c.bf16 %v405_v6, %v403_v5  ;;  %v407_v11 = vld [vmem:[#allocation11 + $0x48] sm:$0xff]  ;;  %v409_v12 = vld [vmem:[#allocation11 + $0x58] sm:$0xff]  ;;  %v891_v13 = vpack.c.bf16 %v404_v10, %v402_v9  ;;  %v406_v15 = vld [vmem:[#allocation11 + $0x40] sm:$0xff] }
  0x7e   :  { %848 = vmatpush3.bf16.msra.mxu1 %v847_v20  ;;  %867 = vmatprep.subr.bf16.mxu0 %v1133_v0  ;;  %v893_v14 = vpack.c.bf16 %v409_v12, %v407_v11  ;;  %v408_v16 = vld [vmem:[#allocation11 + $0x50] sm:$0xff]  ;;  %v411_v17 = vld [vmem:[#allocation11 + $0x68] sm:$0xff]  ;;  %v413_v18 = vld [vmem:[#allocation11 + $0x78] sm:$0xff] }
  0x7f   :  { %849 = vmatprep.subr.bf16.mxu1 %v1133_v0  ;;  %v895_v19 = vpack.c.bf16 %v408_v16, %v406_v15  ;;  %v897_v20 = vpack.c.bf16 %v413_v18, %v411_v17  ;;  %v410_v21 = vld [vmem:[#allocation11 + $0x60] sm:$0xff]  ;;  %v412_v22 = vld [vmem:[#allocation11 + $0x70] sm:$0xff]  ;;  %v417_v24 = vld [vmem:[#allocation11 + $0x98] sm:$0xff] }
  0x80   :  { %v899_v25 = vpack.c.bf16 %v412_v22, %v410_v21  ;;  %v414_v27 = vld [vmem:[#allocation11 + $0x80] sm:$0xff]  ;;  %v416_v28 = vld [vmem:[#allocation11 + $0x90] sm:$0xff]  ;;  %v421_v30 = vld [vmem:[#allocation11 + $0xb8] sm:$0xff] }
  0x81   :  { %869 = vmatpush3.bf16.msra.mxu0 %v868_v41  ;;  %v903_v31 = vpack.c.bf16 %v416_v28, %v414_v27  ;;  %v418_v33 = vld [vmem:[#allocation11 + $0xa0] sm:$0xff]  ;;  %v420_v34 = vld [vmem:[#allocation11 + $0xb0] sm:$0xff]  ;;  %v423_v35 = vld [vmem:[#allocation11 + $0xc8] sm:$0xff] }
  0x82   :  { %851 = vmatpush3.bf16.msra.mxu1 %v850_v23  ;;  %870 = vmatprep.subr.bf16.mxu0 %v1133_v0  ;;  %v415_v23 = vld [vmem:[#allocation11 + $0x88] sm:$0xff]  ;;  %v425_v36 = vld [vmem:[#allocation11 + $0xd8] sm:$0xff]  ;;  %v907_v37 = vpack.c.bf16 %v420_v34, %v418_v33  ;;  %v422_v39 = vld [vmem:[#allocation11 + $0xc0] sm:$0xff] }
  0x83   :  { %852 = vmatprep.subr.bf16.mxu1 %v1133_v0  ;;  %v909_v38 = vpack.c.bf16 %v425_v36, %v423_v35  ;;  %v424_v40 = vld [vmem:[#allocation11 + $0xd0] sm:$0xff]  ;;  %v654_v42 = vld [vmem:[%s1357_s4] ss:$0 sm:$0xff]  ;;  %v518_v59 = vld [vmem:[#allocation12 + $0x20] sm:$0xff] }
  0x84   :  { %v911_v41 = vpack.c.bf16 %v424_v40, %v422_v39  ;;  %v429_v48 = vld [vmem:[#allocation11 + $0xf8] sm:$0xff]  ;;  %v428_v51 = vld [vmem:[#allocation11 + $0xf0] sm:$0xff]  ;;  %v519_v60 = vld [vmem:[#allocation12 + $0x28] sm:$0xff] }
  0x85   :  { %872 = vmatpush3.bf16.msra.mxu0 %v871_v44  ;;  %v521_v62 = vld [vmem:[#allocation12 + $0x38] sm:$0xff]  ;;  %v522_v2 = vld [vmem:[#allocation12 + $0x40] sm:$0xff]  ;;  %v524_v5 = vld [vmem:[#allocation12 + $0x50] sm:$0xff] }
  0x86   :  { %854 = vmatpush3.bf16.msra.mxu1 %v853_v26  ;;  %873 = vmatprep.subr.bf16.mxu0 %v1133_v0  ;;  %v901_v26 = vpack.c.bf16 %v417_v24, %v415_v23  ;;  %v525_v6 = vld [vmem:[#allocation12 + $0x58] sm:$0xff]  ;;  %v527_v9 = vld [vmem:[#allocation12 + $0x68] sm:$0xff]  ;;  %v528_v16 = vld [vmem:[#allocation12 + $0x70] sm:$0xff] }
  0x87   :  { %855 = vmatprep.subr.bf16.mxu1 %v1133_v0  ;;  %v655_v11 = vld [vmem:[%s1359_s6] ss:$0 sm:$0xff] }
  0x88   :  { %v529_v17 = vld [vmem:[#allocation12 + $0x78] sm:$0xff] }
  0x89   :  { %875 = vmatpush3.bf16.msra.mxu0 %v874_v47  ;;  %v427_v47 = vld [vmem:[#allocation11 + $0xe8] sm:$0xff]  ;;  %v939_v18 = vpack.c.bf16 %v529_v17, %v528_v16 }
  0x8a   :  { %857 = vmatpush3.bf16.msra.mxu1 %v856_v29  ;;  %876 = vmatprep.subr.bf16.mxu0 %v1133_v0  ;;  %v419_v29 = vld [vmem:[#allocation11 + $0xa8] sm:$0xff]  ;;  %v913_v49 = vpack.c.bf16 %v429_v48, %v427_v47 }
  0x8b   :  { %858 = vmatprep.subr.bf16.mxu1 %v1133_v0 }
  0x8d   :  { %878 = vmatpush3.bf16.msra.mxu0 %v877_v50  ;;  %v426_v50 = vld [vmem:[#allocation11 + $0xe0] sm:$0xff] }
  0x8e   :  { %860 = vmatpush3.bf16.msra.mxu1 %v859_v32  ;;  %879 = vmatprep.subr.bf16.mxu0 %v1133_v0  ;;  %v905_v32 = vpack.c.bf16 %v421_v30, %v419_v29  ;;  %v915_v52 = vpack.c.bf16 %v428_v51, %v426_v50 }
  0x8f   :  { %886 = vmatprep.subr.bf16.mxu1 %v885_v3  ;;  %v523_v3 = vld [vmem:[#allocation12 + $0x48] sm:$0xff] }
  0x90   :  { %v930_v4 = vpack.c.bf16 %v523_v3, %v522_v2 }
  0x91   :  { %881 = vmatpush3.bf16.msra.mxu0 %v880_v53  ;;  %v514_v53 = vld [vmem:[#allocation12] sm:$0xff] }
  0x92   :  { %882 = vmatprep.subr.bf16.mxu0 %v1133_v0 }
  0x95   :  { %884 = vmatpush3.bf16.msra.mxu0 %v883_v61  ;;  %v520_v61 = vld [vmem:[#allocation12 + $0x30] sm:$0xff] }
  0x96   :  { %917 = vmatprep.subr.bf16.mxu0 %v1133_v0  ;;  %v927_v63 = vpack.c.bf16 %v521_v62, %v520_v61 }
 0x14b   :  { %v205_v55 = vpop.f32.mrb[0].mxu0 }
 0x14c   :  { %v206_v56 = vadd.f32 %v652_v54, %v205_v55  ;;  %v725_v57 = vpop.f32.mrb[1].mxu0  ;;  %v515_v54 = vld [vmem:[#allocation12 + $0x8] sm:$0xff]  ;;  %v516_v55 = vld [vmem:[#allocation12 + $0x10] sm:$0xff] }
 0x14d   :  { %v517_v57 = vld [vmem:[#allocation12 + $0x18] sm:$0xff] }
 0x14e   :  { %v209_v58 = vmax.f32 %v206_v56, 0.0  ;;  %v918_v56 = vpack.c.bf16 %v515_v54, %v514_v53 }
 0x150   :  { %759 = vmatmul.mubr.f32.vlgmr.msra.gmra.mrb[0].mxu1 %v209_v58  ;;  %v921_v58 = vpack.c.bf16 %v517_v57, %v516_v55 }
 0x151   :  { %506 = vmatprep.mubr.f32.mxu1 %v1135_v1  ;;  %888 = vmatpush1.bf16.msra.mxu1 %v887_v7  ;;  %v933_v7 = vpack.c.bf16 %v525_v6, %v524_v5 }
 0x152   :  { %890 = vmatprep.subr.bf16.mxu1 %v889_v8  ;;  %v526_v8 = vld [vmem:[#allocation12 + $0x60] sm:$0xff] }
 0x153   :  { %v936_v10 = vpack.c.bf16 %v527_v9, %v526_v8 }
 0x155   :  { %892 = vmatpush1.bf16.msra.mxu1 %v891_v13 }
 0x156   :  { %894 = vmatprep.subr.bf16.mxu1 %v893_v14 }
 0x159   :  { %896 = vmatpush1.bf16.msra.mxu1 %v895_v19  ;;  %v432_v19 = vlaneseq }
 0x15a   :  { %898 = vmatprep.subr.bf16.mxu1 %v897_v20 }
 0x15b   :  { %v433_v20 = vshrl.u32 %v432_v19, 7 }
 0x15d   :  { %900 = vmatpush1.bf16.msra.mxu1 %v899_v25  ;;  %v434_v21 = vsub.s32 0, %v433_v20  ;;  %v438_v27 = vsub.s32 1, %v433_v20 }
 0x15e   :  { %902 = vmatprep.subr.bf16.mxu1 %v901_v26 }
 0x161   :  { %904 = vmatpush1.bf16.msra.mxu1 %v903_v31  ;;  %v656_v31 = vld [vmem:[%s1363_s10] ss:$0 sm:$0xff]  ;;  %s1136_s10 = smov [#allocation14]  }
 0x162   :  { %906 = vmatprep.subr.bf16.mxu1 %v905_v32  ;;  %v610_v32 = vand.u32 127, %v432_v19  ;;  %s640_s3 = sshll.u32 %s1136_s10, 4  ;;  %s641_s3 = int_to_ptr.vmem [resolvable:$true] %s640_s3 }
 0x163   :  { %s1091_s26 = scalar_lea.vmem %s641_s3, 128  ;;  %p1096_p7 = scmp.lt.s32.totalorder %s641_s3, %s641_s3 }
 0x164   :  { %vm611_vm2 = vcmp.lt.s32.totalorder %v610_v32, 4  ;;  %vm628_vm3 = vcmp.lt.s32.totalorder %v610_v32, 8  ;;  %p1092_p6 = scmp.ne.s32.totalorder %s641_s3, %s1091_s26  ;;  %p1097_p8 = scmp.lt.s32.totalorder %s1091_s26, %s1091_s26 }
 0x165   :  { %908 = vmatpush1.bf16.msra.mxu1 %v907_v37 }
 0x166   :  { %910 = vmatprep.subr.bf16.mxu1 %v909_v38  ;;  %p1098_p9 = por %p1097_p8, %p1096_p7 }
 0x168   :  { %p1099_p10 = pnand %p1098_p9, %p1092_p6 }
 0x169   :  { %912 = vmatpush1.bf16.msra.mxu1 %v911_v41 }
 0x16a   :  { %914 = vmatprep.subr.bf16.mxu1 %v913_v49 }
 0x16d   :  { %916 = vmatpush1.bf16.msra.mxu1 %v915_v52 }
 0x223   :  { %v299_v43 = vpop.f32.mrb[0].mxu1 }
 0x224   :  { %v300_v44 = vadd.f32 %v654_v42, %v299_v43  ;;  %v760_v45 = vpop.f32.mrb[1].mxu1 }
 0x226   :  { %v303_v46 = vmax.f32 %v300_v44, 0.0  ;;  %v624_v44 = vstv %s1364_s11 }
 0x228   :  { %794 = vmatmul.mubr.f32.vlgmr.msra.gmra.mrb[2].mxu0 %v303_v46 }
 0x229   :  { %828 = vmatprep.mubr.msk.f32.mxu0 %vm1134_vm0, %v1135_v1  ;;  %919 = vmatpush3.bf16.msra.mxu0 %v918_v56  ;;  %v924_v1 = vpack.c.bf16 %v519_v60, %v518_v59 }
 0x22a   :  { %920 = vmatprep.subr.bf16.mxu0 %v1133_v0 }
 0x22d   :  { %922 = vmatpush3.bf16.msra.mxu0 %v921_v58 }
 0x22e   :  { %923 = vmatprep.subr.bf16.mxu0 %v1133_v0 }
 0x231   :  { %925 = vmatpush3.bf16.msra.mxu0 %v924_v1 }
 0x232   :  { %926 = vmatprep.subr.bf16.mxu0 %v1133_v0 }
 0x235   :  { %928 = vmatpush3.bf16.msra.mxu0 %v927_v63 }
 0x236   :  { %929 = vmatprep.subr.bf16.mxu0 %v1133_v0 }
 0x239   :  { %931 = vmatpush3.bf16.msra.mxu0 %v930_v4 }
 0x23a   :  { %932 = vmatprep.subr.bf16.mxu0 %v1133_v0 }
 0x23d   :  { %934 = vmatpush3.bf16.msra.mxu0 %v933_v7 }
 0x23e   :  { %935 = vmatprep.subr.bf16.mxu0 %v1133_v0 }
 0x241   :  { %937 = vmatpush3.bf16.msra.mxu0 %v936_v10 }
 0x242   :  { %938 = vmatprep.subr.bf16.mxu0 %v1133_v0  ;;  %v430_v0 = vld [vmem:[%s1361_s8] sm:$0x3] }
 0x243   :  { %v435_v22 = vrot.slane %v430_v0, %v434_v21  ;;  %v439_v28 = vrot.slane %v430_v0, %v438_v27 }
 0x245   :  { %940 = vmatpush3.bf16.msra.mxu0 %v939_v18 }
 0x2fb   :  { %v393_v12 = vpop.f32.mrb[2].mxu0 }
 0x2fc   :  { %v394_v13 = vadd.f32 %v655_v11, %v393_v12  ;;  %v795_v14 = vpop.f32.mrb[3].mxu0 }
 0x2fe   :  { %v397_v15 = vmax.f32 %v394_v13, 0.0 }
 0x300   :  { %507 = vmatmul.mubr.f32.vlgmr.msra.gmra.mrb[2].mxu1 %v397_v15 }
 0x3d3   :  { %v508_v23 = vpop.f32.mrb[2].mxu1 }
 0x3d4   :  { %v509_v24 = vadd.f32 %v508_v23, %v435_v22  ;;  %v510_v25 = vpop.f32.mrb[3].mxu1 }
 0x3d5   :  { %v511_v29 = vadd.f32 %v510_v25, %v439_v28 }
 0x3d6   :  { %v513_v26 = vmax.f32 %v509_v24, 0.0 }
 0x3d8   :  { %829 = vmatmul.mubr.f32.vlgmr.msra.gmra.mrb[4].mxu0 %v513_v26 }
 0x4ab   :  { %v596_v30 = vpop.f32.mrb[4].mxu0 }
 0x4ac   :  { %v597_v33 = vadd.f32 %v596_v30, %v511_v29  ;;  %v830_v34 = vpop.f32.mrb[5].mxu0 }
 0x4ae   :  { %v607_v35 = vadd.f32 %v656_v31, %v597_v33 }
 0x4b0   :  { %v612_v36 = vmul.f32 2.0, %v607_v35 }
 0x4b2   :  { %v615_v37 = vsel %vm611_vm2, %v612_v36, %v607_v35 }
 0x4b3   :  { %v657_v38 = vmul.f32 -1.442695, %v615_v37 }
 0x4b5   :  { %955 = vpow2.f32 %v657_v38 }
 0x4bf   :  { %v956_v39 = vpop.eup %955 }
 0x4c0   :  { %v619_v40 = vadd.f32 1.0, %v956_v39 }
 0x4c2   :  { %957 = vrcp.f32 %v619_v40 }
 0x4cc   :  { %v958_v41 = vpop.eup %957 }
 0x4cd   :  { %v622_v42 = vmul.f32 2.0, %v958_v41  ;;  %v626_v43 = vmul.f32 10.0, %v958_v41 }
 0x4cf   :  { %v658_v45 = vadd.f32 -1.0, %v622_v42  ;;  %v627_v46 = vadd.f32 0.0001, %v626_v43 }
 0x4d1   :  { %v625_v47 = vmul.f32 %v658_v45, %v624_v44  ;;  %v631_v48 = vsel %vm628_vm3, %v627_v46, %v607_v35 }
 0x4d3   :  { %v632_v49 = vsel %vm611_vm2, %v625_v47, %v631_v48 }
 0x4d4   :  { %633 = vst [vmem:[#allocation14] sm:$0xff] %v632_v49 }
 0x4d5   :  { %1102 = shalt.err (!%p1099_p10)
}
 0x4d6   :  { %s1103_s29 = scalar_lea.hbm %s1365_s12, 128 }
 0x4d7   :  { %p1104_p11 = scmp.ne.s32.totalorder %s1365_s12, %s1103_s29  ;;  %p1107_p12 = scmp.lt.u32.totalorder %s1103_s29, %s1365_s12 }
 0x4d9   :  { %p1109_p13 = pnand %p1107_p12, %p1104_p11 }
 0x4db   :  { %1112 = shalt.err (!%p1109_p13)
}
 0x4dc   :  { %643 = dma.vmem_to_hbm [thread:$0]  %s641_s3, 128, %s1365_s12, [#allocation5]  }
 0x4dd   :  { %1121 = dma.done.wait [#allocation5], 128  }
 0x4de   :  { %1122 = vsyncadd [#allocation5], 4294967168 }
 0x4df   :  { %647 = vsyncpa [#allocation4], 1 }
 0x4e0   :  { %648 = vsyncpa [#allocation7], 1 }
 0x4e1   :  { %649 = vsyncpa [#allocation10], 1 }
 0x4e2   :  { %650 = vsyncpa [#allocation13], 1 }
 0x4e3   :  { %651 = vsyncpa [#allocation5], 1 }

</bundles_post_ra>
